<compile_context>
chip_gen: v5e
topology: v5e:2x2
jax: 0.10.0
libtpu: 0.0.40
codegen_flags: <defaults>
</compile_context>

<pallas_src>
import math
import jax
import jax.numpy as jnp
from jax.experimental import pallas as pl
from jax.experimental.pallas import tpu as pltpu


# ------------------------- kernel -------------------------

def posenc_add_kernel(x_ref, pe_ref, o_ref):
    # x_ref / o_ref: (B, tile_L) slab (batch on sublanes, lane-dense last axis).
    # pe_ref:        (1, tile_L) positional-encoding slab, broadcast over sublanes.
    # Dropout is identity (eval mode).
    o_ref[...] = x_ref[...] + pe_ref[...]


# ------------------------- buffer construction (torch __init__) -------------------------

def make_positional_encoding_buffer(d_model, max_len=5000):
    """Equivalent of the torch-registered `pe` buffer, shape (max_len, d_model)."""
    position = jnp.arange(max_len, dtype=jnp.float32)[:, None]                 # (L, 1)
    div_term = jnp.exp(jnp.arange(0, d_model, 2, dtype=jnp.float32)
                       * (-(math.log(10000.0) / d_model)))                     # (ceil(d/2),)
    angles = position * div_term                                               # (L, ceil(d/2))
    pe = jnp.zeros((max_len, d_model), jnp.float32)
    pe = pe.at[:, 0::2].set(jnp.sin(angles))
    pe = pe.at[:, 1::2].set(jnp.cos(angles)[:, : d_model // 2])                # odd-d safe
    return pe


def pack_pe_slab(pe, seq_len):
    """Precompute the (1, T*D) lane-dense pe slab once (hoisted out of forward)."""
    T = int(seq_len)
    D = pe.shape[1]
    return pe[:T].reshape(1, T * D)


# ------------------------- tiling policy -------------------------

# Per-operand block budget (bytes). Keeps double-buffered x / pe / out blocks well
# under v7x's 32 MiB scoped-default / 64 MiB physical VMEM at production shapes.
_BLOCK_BYTES_CAP = 4 * 1024 * 1024


def _choose_num_tiles(B, L, itemsize):
    """Number of lane-axis tiles; 1 means a single whole-slab grid step."""
    if B * L * itemsize <= _BLOCK_BYTES_CAP:
        return 1
    n = 2
    while n <= max(L // 128, 1):
        if L % n == 0:
            tile_L = L // n
            if tile_L % 128 == 0 and B * tile_L * itemsize <= _BLOCK_BYTES_CAP:
                return n
        n += 1
    return 1  # no clean 128-aligned split found; fall back to one block


# ------------------------- wrapper -------------------------

@jax.jit
def positional_encoding_forward(x, pe_slab):
    """x: (B, T, D) float32; pe_slab: (1, T*D) precomputed slab. Returns x + pe."""
    B, T, D = x.shape
    L = T * D
    assert pe_slab.shape == (1, L), (pe_slab.shape, (1, L))

    # Batch on the sublane axis, lane-dense last axis (layout plumbing only).
    x2 = x.reshape(B, L)

    num_tiles = _choose_num_tiles(B, L, jnp.dtype(x.dtype).itemsize)
    tile_L = L // num_tiles

    extra = {}
    if num_tiles > 1:
        extra["compiler_params"] = pltpu.CompilerParams(
            dimension_semantics=("parallel",))

    out = pl.pallas_call(
        posenc_add_kernel,
        out_shape=jax.ShapeDtypeStruct((B, L), x.dtype),
        grid=(num_tiles,),
        in_specs=[
            pl.BlockSpec((B, tile_L), lambda t: (0, t)),   # x slab tile
            pl.BlockSpec((1, tile_L), lambda t: (0, t)),   # pe tile (sublane-broadcast)
        ],
        out_specs=pl.BlockSpec((B, tile_L), lambda t: (0, t)),
        input_output_aliases={0: 0},                       # write back into the x slab
        **extra,
    )(x2, pe_slab)
    return out.reshape(B, T, D)


# ------------------------- pure-JAX reference -------------------------

def positional_encoding_ref(x, pe):
    return x + pe[None, : x.shape[1], :]


# ------------------------- main -------------------------

if __name__ == "__main__":
    B, T, D_MODEL = 2, 8, 32
    MAX_LEN = 5000
    DROPOUT = 0.1  # identity in eval mode

    key = jax.random.PRNGKey(0)
    kx, _ = jax.random.split(key)

    pe = make_positional_encoding_buffer(D_MODEL, MAX_LEN)   # __init__ buffer
    pe_slab = pack_pe_slab(pe, T)                            # hoisted out of forward
    x = jax.random.normal(kx, (B, T, D_MODEL), jnp.float32)

    out = positional_encoding_forward(x, pe_slab)
    out = jax.block_until_ready(out)

    ref = positional_encoding_ref(x, pe)
    assert out.shape == (B, T, D_MODEL)
    assert jnp.allclose(out, ref, atol=1e-6, rtol=1e-6), (
        f"max err {jnp.max(jnp.abs(out - ref))}")
    print("KERNEL_OK")
</pallas_src>

<mosaic_0001>
module attributes {stable_mosaic.version = 11 : i64} {
  func.func @posenc_add_kernel(%arg0: i32, %arg1: memref<2x256xf32, #tpu.memory_space<vmem>>, %arg2: memref<1x256xf32, #tpu.memory_space<vmem>>, %arg3: memref<2x256xf32, #tpu.memory_space<vmem>>) attributes {dimension_semantics = [#tpu.dimension_semantics<arbitrary>], iteration_bounds = array<i64: 1>, scalar_prefetch = 0 : i64, scratch_operands = 0 : i64, tpu.core_type = #tpu.core_type<tc>, window_params = [{transform_indices = @transform_0, window_bounds = array<i64: 2, 256>}, {transform_indices = @transform_1, window_bounds = array<i64: 1, 256>}, {transform_indices = @transform_2, window_bounds = array<i64: 2, 256>}]} {
    %c0 = arith.constant 0 : index
    %c0_0 = arith.constant 0 : index
    %0 = vector.load %arg1[%c0, %c0_0] : memref<2x256xf32, #tpu.memory_space<vmem>>, vector<2x256xf32>
    %c0_1 = arith.constant 0 : index
    %c0_2 = arith.constant 0 : index
    %1 = vector.load %arg2[%c0_1, %c0_2] : memref<1x256xf32, #tpu.memory_space<vmem>>, vector<1x256xf32>
    %2 = vector.broadcast %1 : vector<1x256xf32> to vector<2x256xf32>
    %3 = arith.addf %0, %2 : vector<2x256xf32>
    %c0_3 = arith.constant 0 : index
    %c0_4 = arith.constant 0 : index
    %4 = vector.load %arg3[%c0_3, %c0_4] : memref<2x256xf32, #tpu.memory_space<vmem>>, vector<2x256xf32>
    tpu.vector_store %arg3[%c0_3, %c0_4], %3 {strides = array<i32>} : memref<2x256xf32, #tpu.memory_space<vmem>>, vector<2x256xf32>,
    return
  }
  func.func @transform_0(%arg0: i32) -> (i32, i32) {
    %c0_i32 = arith.constant 0 : i32
    %c0_i32_0 = arith.constant 0 : i32
    return %c0_i32, %arg0 : i32, i32
  }
  func.func @transform_1(%arg0: i32) -> (i32, i32) {
    %c0_i32 = arith.constant 0 : i32
    %c0_i32_0 = arith.constant 0 : i32
    return %c0_i32, %arg0 : i32, i32
  }
  func.func @transform_2(%arg0: i32) -> (i32, i32) {
    %c0_i32 = arith.constant 0 : i32
    %c0_i32_0 = arith.constant 0 : i32
    return %c0_i32, %arg0 : i32, i32
  }
}

</mosaic_0001>

<bundles_post_ra>
// kernel: positional_encoding_forward.1
= control target key start
LH: loop header
LB: loop body
LE: loop exit
PB: predicated region body
PF: predicated region fallthrough
CT: control target
= control target key end

     0   :  { %vm17_vm0 = vcmask 1041408   ;;  %s50_s1 = inlined_call_operand.vmem [shape: f32[1,256], index: 1, kind: input, shape index: {}]   ;;  %s51_s0 = inlined_call_operand.vmem [shape: f32[2,256], index: 0, kind: input, shape index: {}, may-alias: {0,2}]   ;;  %s52_s2 = inlined_call_operand.vmem [shape: f32[2,256], index: 2, kind: output, shape index: {}, may-alias: {0,2}]  }
   0x1   :  { %v12_v0 = vld [vmem:[%s50_s1] sm:$0x3] }
   0x2   :  { %v14_v1 = vperm.slane %v12_v0, 0  ;;  %v15_v2 = vperm.slane %v12_v0, 1  ;;  %v11_v3 = vld [vmem:[%s51_s0] sm:$0xf] }
   0x4   :  { %v16_v4 = vrot.slane %v15_v2, 6 }
   0x6   :  { %v18_v5 = vsel %vm17_vm0, %v14_v1, %v16_v4 }
   0x7   :  { %v20_v6 = vadd.f32 %v18_v5, %v11_v3 }
   0x9   :  { %21 = vst [vmem:[%s52_s2] sm:$0xf] %v20_v6 }

</bundles_post_ra>
